<compile_context>
chip_gen: v6e
topology: v6e:2x2x1
jax: 0.10.0
libtpu: 0.0.40
codegen_flags: <defaults>
</compile_context>

<pallas_src>
import functools
import math

import jax
import jax.numpy as jnp
from jax.experimental import pallas as pl
from jax.experimental.pallas import tpu as pltpu


def _round_up(x, m):
    return ((x + m - 1) // m) * m


# ------------------------- kernels -------------------------


def _transform_kernel(x_ref, w_ref, b_ref, gamma_ref, beta_ref, o_ref, *, eps):
    # dense: [tm, H] @ [H, H] -> f32 accumulation on the MXU
    h = jnp.dot(x_ref[...], w_ref[...], preferred_element_type=jnp.float32)
    h = h + b_ref[...]
    # exact (erf) gelu, matches torch.nn.functional.gelu default (f32 math)
    h = 0.5 * h * (1.0 + jax.lax.erf(h * (1.0 / math.sqrt(2.0))))
    # LayerNorm over hidden dim (biased variance), fused single-pass moments
    mean = jnp.mean(h, axis=-1, keepdims=True)
    msq = jnp.mean(h * h, axis=-1, keepdims=True)
    var = jnp.maximum(msq - mean * mean, 0.0)
    h = (h - mean) * jax.lax.rsqrt(var + eps)
    h = h * gamma_ref[...] + beta_ref[...]
    o_ref[...] = h.astype(o_ref.dtype)


def _decoder_kernel(x_ref, w_ref, b_ref, o_ref):
    # [tm, H] @ [H, tv] -> f32 accumulation, add vocab bias, narrow store
    acc = jnp.dot(x_ref[...], w_ref[...], preferred_element_type=jnp.float32)
    o_ref[...] = (acc + b_ref[...]).astype(o_ref.dtype)


# ------------------------- parameter prep (hoisted out of forward) -------------------------


def prepare_params(params, *, tv=2048, use_bf16=True):
    """Cast + pad parameters once so the per-call forward does no weight copies."""
    compute_dtype = jnp.bfloat16 if use_bf16 else jnp.float32
    H, V = params["decoder_w"].shape
    tv_eff = max(128, min(tv, _round_up(V, 128)))
    Vp = _round_up(V, tv_eff)

    dec_w = params["decoder_w"].astype(compute_dtype)
    dec_b = params["decoder_b"].reshape(1, V).astype(jnp.float32)
    if Vp != V:
        dec_w = jnp.pad(dec_w, ((0, 0), (0, Vp - V)))
        dec_b = jnp.pad(dec_b, ((0, 0), (0, Vp - V)))

    return {
        "dense_w": params["dense_w"].astype(compute_dtype),
        "dense_b": params["dense_b"].reshape(1, H).astype(jnp.float32),
        "ln_gamma": params["ln_gamma"].reshape(1, H).astype(jnp.float32),
        "ln_beta": params["ln_beta"].reshape(1, H).astype(jnp.float32),
        "decoder_w": dec_w,            # [H, Vp]
        "decoder_b": dec_b,            # [1, Vp]
        "vocab_size": V,               # static python int
        "tv": tv_eff,                  # static python int
    }


# ------------------------- forward wrapper -------------------------


def bert_lm_prediction_head(
    hidden_states,
    prepared,
    *,
    eps=1e-12,
    tm=512,
    out_dtype=None,
    vmem_limit_bytes=48 * 1024 * 1024,   # < 64 MiB so v7x keeps headroom
    h_resident_bytes=8 * 1024 * 1024,    # keep h fully VMEM-resident below this
):
    """hidden_states: [B, S, H] -> logits [B, S, V].

    `prepared` comes from prepare_params(). Default logits dtype follows the
    compute dtype (bf16 fast path halves the dominant HBM writeback).
    """
    B, S, H = hidden_states.shape
    compute_dtype = prepared["dense_w"].dtype
    if out_dtype is None:
        out_dtype = compute_dtype
    V = prepared["vocab_size"]
    Vp = prepared["decoder_w"].shape[1]
    tv_eff = prepared["tv"]
    M = B * S

    # ---- row tiling: bf16 packs 16 rows/sublane-group; >=128 keeps MXU full ----
    row_align = 16 if compute_dtype == jnp.bfloat16 else 8
    if M >= 128:
        row_align = 128
    tm_eff = max(row_align, min(tm, _round_up(M, row_align)))
    Mp = _round_up(M, tm_eff)

    x = hidden_states.reshape(M, H).astype(compute_dtype)
    if Mp != M:
        x = jnp.pad(x, ((0, Mp - M), (0, 0)))

    # ---- stage 1: dense + gelu + layernorm (fused) ----
    # dense_w / bias / gamma / beta have constant index maps -> DMA'd once and
    # kept resident while activation rows stream.
    transform = pl.pallas_call(
        functools.partial(_transform_kernel, eps=eps),
        out_shape=jax.ShapeDtypeStruct((Mp, H), compute_dtype),
        grid_spec=pltpu.PrefetchScalarGridSpec(
            num_scalar_prefetch=0,
            grid=(Mp // tm_eff,),
            in_specs=[
                pl.BlockSpec((tm_eff, H), lambda i: (i, 0)),
                pl.BlockSpec((H, H), lambda i: (0, 0)),
                pl.BlockSpec((1, H), lambda i: (0, 0)),
                pl.BlockSpec((1, H), lambda i: (0, 0)),
                pl.BlockSpec((1, H), lambda i: (0, 0)),
            ],
            out_specs=pl.BlockSpec((tm_eff, H), lambda i: (i, 0)),
        ),
        compiler_params=pltpu.CompilerParams(
            dimension_semantics=("parallel",),
            vmem_limit_bytes=vmem_limit_bytes,
        ),
    )
    h = transform(
        x,
        prepared["dense_w"],
        prepared["dense_b"],
        prepared["ln_gamma"],
        prepared["ln_beta"],
    )

    # ---- stage 2: decoder projection to vocab ----
    # Grid = (vocab tiles, M tiles) with M innermost: the (H, tv) weight tile
    # keeps the same block index across the inner loop, so the full decoder
    # weight is read from HBM only once per vocab tile (per core). When the
    # activation slab is small enough, use a single M tile so h is read from
    # HBM exactly once and stays VMEM-resident across all vocab tiles.
    itemsize = jnp.dtype(compute_dtype).itemsize
    if Mp * H * itemsize <= h_resident_bytes:
        tm_dec = Mp
    else:
        tm_dec = tm_eff

    decoder = pl.pallas_call(
        _decoder_kernel,
        out_shape=jax.ShapeDtypeStruct((Mp, Vp), out_dtype),
        grid_spec=pltpu.PrefetchScalarGridSpec(
            num_scalar_prefetch=0,
            grid=(Vp // tv_eff, Mp // tm_dec),
            in_specs=[
                pl.BlockSpec((tm_dec, H), lambda j, i: (i, 0)),
                pl.BlockSpec((H, tv_eff), lambda j, i: (0, j)),
                pl.BlockSpec((1, tv_eff), lambda j, i: (0, j)),
            ],
            out_specs=pl.BlockSpec((tm_dec, tv_eff), lambda j, i: (i, j)),
        ),
        compiler_params=pltpu.CompilerParams(
            # Only the vocab axis is "parallel": the v7x megacore split lands
            # on V, so each core still reads every weight tile exactly once.
            dimension_semantics=("parallel", "arbitrary"),
            vmem_limit_bytes=vmem_limit_bytes,
        ),
    )
    logits = decoder(h, prepared["decoder_w"], prepared["decoder_b"])

    if Mp != M or Vp != V:
        # TODO(synk): for padded vocabs, fold the mask into the loss instead of
        # materializing this slice (extra full pass over the logits in HBM).
        logits = logits[:M, :V]
    return logits.reshape(B, S, V)


# ------------------------- reference & test -------------------------


def init_params(key, hidden_size, vocab_size):
    k1, k2, k3 = jax.random.split(key, 3)
    scale = 0.02
    return {
        # stored as [in, out] (transpose of torch's [out, in])
        "dense_w": scale * jax.random.normal(k1, (hidden_size, hidden_size), jnp.float32),
        "dense_b": scale * jax.random.normal(k2, (hidden_size,), jnp.float32),
        "ln_gamma": jnp.ones((hidden_size,), jnp.float32),
        "ln_beta": jnp.zeros((hidden_size,), jnp.float32),
        "decoder_w": scale * jax.random.normal(k3, (hidden_size, vocab_size), jnp.float32),
        "decoder_b": jnp.zeros((vocab_size,), jnp.float32),  # self.bias init to zeros
    }


def _reference(hidden_states, params, eps=1e-12):
    h = hidden_states @ params["dense_w"] + params["dense_b"]
    h = 0.5 * h * (1.0 + jax.lax.erf(h / jnp.sqrt(2.0)))
    mean = jnp.mean(h, axis=-1, keepdims=True)
    var = jnp.mean(jnp.square(h - mean), axis=-1, keepdims=True)
    h = (h - mean) / jnp.sqrt(var + eps)
    h = h * params["ln_gamma"] + params["ln_beta"]
    return h @ params["decoder_w"] + params["decoder_b"]


if __name__ == "__main__":
    key = jax.random.PRNGKey(0)

    # Case 1: small, tile-aligned shapes.
    B, S, H, V = 2, 8, 32, 128
    kp, kx = jax.random.split(key)
    params = init_params(kp, H, V)
    x = jax.random.normal(kx, (B, S, H), jnp.float32)
    ref = _reference(x, params)

    # f32 path: exact check against reference (f32 operands + f32 logits).
    prep_f32 = prepare_params(params, use_bf16=False)
    logits_f32 = bert_lm_prediction_head(x, prep_f32, out_dtype=jnp.float32)
    logits_f32 = jax.block_until_ready(logits_f32)
    assert logits_f32.shape == (B, S, V)
    assert jnp.allclose(logits_f32, ref, atol=1e-4, rtol=1e-4), "f32 mismatch vs reference"

    # bf16 fast path (default): bf16 operands + bf16 logits, f32 MXU accumulation.
    prep_bf16 = prepare_params(params, use_bf16=True)
    logits_bf16 = bert_lm_prediction_head(x, prep_bf16)
    logits_bf16 = jax.block_until_ready(logits_bf16)
    assert logits_bf16.shape == (B, S, V)
    assert logits_bf16.dtype == jnp.bfloat16
    assert jnp.allclose(
        logits_bf16.astype(jnp.float32), ref, atol=2e-2, rtol=2e-2
    ), "bf16 mismatch vs reference"

    # Case 2: non-tile-divisible M and V (exercises padding / clamped tiles).
    B2, S2, H2, V2 = 2, 7, 32, 100
    kp2, kx2 = jax.random.split(jax.random.PRNGKey(1))
    params2 = init_params(kp2, H2, V2)
    x2 = jax.random.normal(kx2, (B2, S2, H2), jnp.float32)
    prep2 = prepare_params(params2, use_bf16=True)
    logits2 = bert_lm_prediction_head(x2, prep2)
    logits2 = jax.block_until_ready(logits2)
    ref2 = _reference(x2, params2)
    assert logits2.shape == (B2, S2, V2)
    assert jnp.allclose(
        logits2.astype(jnp.float32), ref2, atol=2e-2, rtol=2e-2
    ), "padded-case mismatch vs reference"

    print("KERNEL_OK")
</pallas_src>

<mosaic_0001>
module attributes {stable_mosaic.version = 11 : i64} {
  func.func @_transform_kernel(%arg0: i32, %arg1: memref<16x32xf32, #tpu.memory_space<vmem>>, %arg2: memref<32x32xf32, #tpu.memory_space<vmem>>, %arg3: memref<1x32xf32, #tpu.memory_space<vmem>>, %arg4: memref<1x32xf32, #tpu.memory_space<vmem>>, %arg5: memref<1x32xf32, #tpu.memory_space<vmem>>, %arg6: memref<16x32xf32, #tpu.memory_space<vmem>>) attributes {dimension_semantics = [#tpu.dimension_semantics<parallel>], iteration_bounds = array<i64: 1>, scalar_prefetch = 0 : i64, scratch_operands = 0 : i64, tpu.core_type = #tpu.core_type<tc>, window_params = [{transform_indices = @transform_0, window_bounds = array<i64: 16, 32>}, {pipeline_mode = #tpu.pipeline_mode<synchronous>, transform_indices = @transform_1, window_bounds = array<i64: 32, 32>}, {pipeline_mode = #tpu.pipeline_mode<synchronous>, transform_indices = @transform_2, window_bounds = array<i64: 1, 32>}, {pipeline_mode = #tpu.pipeline_mode<synchronous>, transform_indices = @transform_3, window_bounds = array<i64: 1, 32>}, {pipeline_mode = #tpu.pipeline_mode<synchronous>, transform_indices = @transform_4, window_bounds = array<i64: 1, 32>}, {transform_indices = @transform_5, window_bounds = array<i64: 16, 32>}]} {
    %c0 = arith.constant 0 : index
    %c0_0 = arith.constant 0 : index
    %0 = vector.load %arg1[%c0, %c0_0] : memref<16x32xf32, #tpu.memory_space<vmem>>, vector<16x32xf32>
    %c0_1 = arith.constant 0 : index
    %c0_2 = arith.constant 0 : index
    %1 = vector.load %arg2[%c0_1, %c0_2] : memref<32x32xf32, #tpu.memory_space<vmem>>, vector<32x32xf32>
    %cst = arith.constant dense<0.000000e+00> : vector<16x32xf32>
    %2 = tpu.matmul %0, %1, %cst {dimension_numbers = #tpu.dot_dimension_numbers<[1], [0], [0], [1], [0, 0, 1, 1], [], []>} : vector<16x32xf32>, vector<32x32xf32>, vector<16x32xf32> -> vector<16x32xf32>
    %c0_3 = arith.constant 0 : index
    %c0_4 = arith.constant 0 : index
    %3 = vector.load %arg3[%c0_3, %c0_4] : memref<1x32xf32, #tpu.memory_space<vmem>>, vector<1x32xf32>
    %4 = vector.broadcast %3 : vector<1x32xf32> to vector<16x32xf32>
    %5 = arith.addf %2, %4 : vector<16x32xf32>
    %cst_5 = arith.constant 5.000000e-01 : f32
    %6 = vector.broadcast %cst_5 : f32 to vector<16x32xf32>
    %7 = arith.mulf %6, %5 : vector<16x32xf32>
    %cst_6 = arith.constant 0.707106769 : f32
    %8 = vector.broadcast %cst_6 : f32 to vector<16x32xf32>
    %9 = arith.mulf %5, %8 : vector<16x32xf32>
    %10 = math.erf %9 : vector<16x32xf32>
    %cst_7 = arith.constant 1.000000e+00 : f32
    %11 = vector.broadcast %cst_7 : f32 to vector<16x32xf32>
    %12 = arith.addf %11, %10 : vector<16x32xf32>
    %13 = arith.mulf %7, %12 : vector<16x32xf32>
    %cst_8 = arith.constant dense<0.000000e+00> : vector<16xf32>
    %14 = vector.multi_reduction <add>, %13, %cst_8 [1] : vector<16x32xf32> to vector<16xf32>
    %15 = vector.shape_cast %14 : vector<16xf32> to vector<16x1xf32>
    %cst_9 = arith.constant 3.200000e+01 : f32
    %16 = vector.broadcast %cst_9 : f32 to vector<16x1xf32>
    %17 = arith.divf %15, %16 : vector<16x1xf32>
    %18 = arith.mulf %13, %13 : vector<16x32xf32>
    %cst_10 = arith.constant dense<0.000000e+00> : vector<16xf32>
    %19 = vector.multi_reduction <add>, %18, %cst_10 [1] : vector<16x32xf32> to vector<16xf32>
    %20 = vector.shape_cast %19 : vector<16xf32> to vector<16x1xf32>
    %cst_11 = arith.constant 3.200000e+01 : f32
    %21 = vector.broadcast %cst_11 : f32 to vector<16x1xf32>
    %22 = arith.divf %20, %21 : vector<16x1xf32>
    %23 = arith.mulf %17, %17 : vector<16x1xf32>
    %24 = arith.subf %22, %23 : vector<16x1xf32>
    %cst_12 = arith.constant 0.000000e+00 : f32
    %25 = vector.broadcast %cst_12 : f32 to vector<16x1xf32>
    %26 = arith.maximumf %24, %25 : vector<16x1xf32>
    %27 = vector.broadcast %17 : vector<16x1xf32> to vector<16x32xf32>
    %28 = arith.subf %13, %27 : vector<16x32xf32>
    %cst_13 = arith.constant 9.99999996E-13 : f32
    %29 = vector.broadcast %cst_13 : f32 to vector<16x1xf32>
    %30 = arith.addf %26, %29 : vector<16x1xf32>
    %31 = math.rsqrt %30 : vector<16x1xf32>
    %32 = vector.broadcast %31 : vector<16x1xf32> to vector<16x32xf32>
    %33 = arith.mulf %28, %32 : vector<16x32xf32>
    %c0_14 = arith.constant 0 : index
    %c0_15 = arith.constant 0 : index
    %34 = vector.load %arg4[%c0_14, %c0_15] : memref<1x32xf32, #tpu.memory_space<vmem>>, vector<1x32xf32>
    %35 = vector.broadcast %34 : vector<1x32xf32> to vector<16x32xf32>
    %36 = arith.mulf %33, %35 : vector<16x32xf32>
    %c0_16 = arith.constant 0 : index
    %c0_17 = arith.constant 0 : index
    %37 = vector.load %arg5[%c0_16, %c0_17] : memref<1x32xf32, #tpu.memory_space<vmem>>, vector<1x32xf32>
    %38 = vector.broadcast %37 : vector<1x32xf32> to vector<16x32xf32>
    %39 = arith.addf %36, %38 : vector<16x32xf32>
    %c0_18 = arith.constant 0 : index
    %c0_19 = arith.constant 0 : index
    %40 = vector.load %arg6[%c0_18, %c0_19] : memref<16x32xf32, #tpu.memory_space<vmem>>, vector<16x32xf32>
    tpu.vector_store %arg6[%c0_18, %c0_19], %39 {strides = array<i32>} : memref<16x32xf32, #tpu.memory_space<vmem>>, vector<16x32xf32>,
    return
  }
  func.func @transform_0(%arg0: i32) -> (i32, i32) {
    %c0_i32 = arith.constant 0 : i32
    %c0_i32_0 = arith.constant 0 : i32
    return %arg0, %c0_i32 : i32, i32
  }
  func.func @transform_1(%arg0: i32) -> (i32, i32) {
    %c0_i32 = arith.constant 0 : i32
    %c0_i32_0 = arith.constant 0 : i32
    %c0_i32_1 = arith.constant 0 : i32
    return %c0_i32, %c0_i32_0 : i32, i32
  }
  func.func @transform_2(%arg0: i32) -> (i32, i32) {
    %c0_i32 = arith.constant 0 : i32
    %c0_i32_0 = arith.constant 0 : i32
    %c0_i32_1 = arith.constant 0 : i32
    return %c0_i32, %c0_i32_0 : i32, i32
  }
  func.func @transform_3(%arg0: i32) -> (i32, i32) {
    %c0_i32 = arith.constant 0 : i32
    %c0_i32_0 = arith.constant 0 : i32
    %c0_i32_1 = arith.constant 0 : i32
    return %c0_i32, %c0_i32_0 : i32, i32
  }
  func.func @transform_4(%arg0: i32) -> (i32, i32) {
    %c0_i32 = arith.constant 0 : i32
    %c0_i32_0 = arith.constant 0 : i32
    %c0_i32_1 = arith.constant 0 : i32
    return %c0_i32, %c0_i32_0 : i32, i32
  }
  func.func @transform_5(%arg0: i32) -> (i32, i32) {
    %c0_i32 = arith.constant 0 : i32
    %c0_i32_0 = arith.constant 0 : i32
    return %arg0, %c0_i32 : i32, i32
  }
}

</mosaic_0001>

<bundles_post_ra>
// kernel: tpu_custom_call.1
= control target key start
LH: loop header
LB: loop body
LE: loop exit
PB: predicated region body
PF: predicated region fallthrough
CT: control target
= control target key end

     0   :  { %10 = vsyncpa [#allocation3], 0  ;;  %s396_s0 = inlined_call_operand.hbm [shape: f32[16,32], index: 0, kind: input, shape index: {}]   ;;  %s397_s1 = inlined_call_operand.hbm [shape: f32[32,32], index: 1, kind: input, shape index: {}]   ;;  %s398_s2 = inlined_call_operand.vmem [shape: f32[1,32], index: 2, kind: input, shape index: {}]   ;;  %s399_s3 = inlined_call_operand.vmem [shape: f32[1,32], index: 3, kind: input, shape index: {}]   ;;  %s400_s4 = inlined_call_operand.vmem [shape: f32[1,32], index: 4, kind: input, shape index: {}]   ;;  %s401_s5 = inlined_call_operand.hbm [shape: f32[16,32], index: 5, kind: output, shape index: {}]  }
   0x1   :  { %11 = vsyncpa [#allocation6], 0 }
   0x2   :  { %12 = vsyncpa [#allocation4], 0  ;;  %s326_s18 = smov [#allocation2]  }
   0x3   :  { %s18_s19 = sshll.u32 %s326_s18, 4  ;;  %s19_s19 = int_to_ptr.vmem [resolvable:$true] %s18_s19 }
   0x4   :  { %s268_s20 = scalar_lea.vmem %s19_s19, 256  ;;  %p273_p1 = scmp.lt.s32.totalorder %s19_s19, %s19_s19 }
   0x5   :  { %p269_p0 = scmp.ne.s32.totalorder %s19_s19, %s268_s20  ;;  %p274_p2 = scmp.lt.s32.totalorder %s268_s20, %s268_s20 }
   0x7   :  { %p275_p3 = por %p274_p2, %p273_p1 }
   0x9   :  { %p276_p4 = pnand %p275_p3, %p269_p0 }
   0xb   :  { %279 = shalt.err (!%p276_p4)
}
   0xc   :  { %s327_s21 = smov 128   ;;  %s328_s22 = smov 8  }
   0xd   :  { %24 = dma.hbm_to_vmem [thread:$0]  %s396_s0, 256, %s19_s19, [#allocation3], %s327_s21, %s327_s21, %s328_s22  }
   0xe   :  { %s329_s25 = smov [#allocation5]  }
   0xf   :  { %s30_s26 = sshll.u32 %s329_s25, 4  ;;  %s31_s26 = int_to_ptr.vmem [resolvable:$true] %s30_s26 }
  0x10   :  { %s288_s27 = scalar_lea.vmem %s31_s26, 512  ;;  %p293_p6 = scmp.lt.s32.totalorder %s31_s26, %s31_s26 }
  0x11   :  { %p289_p5 = scmp.ne.s32.totalorder %s31_s26, %s288_s27  ;;  %p294_p7 = scmp.lt.s32.totalorder %s288_s27, %s288_s27 }
  0x13   :  { %p295_p8 = por %p294_p7, %p293_p6 }
  0x15   :  { %p296_p9 = pnand %p295_p8, %p289_p5 }
  0x17   :  { %299 = shalt.err (!%p296_p9)
}
  0x18   :  { %36 = dma.hbm_to_vmem [thread:$0]  %s397_s1, 512, %s31_s26, [#allocation6], %s327_s21, %s327_s21, %s328_s22  }
  0x19   :  { %320 = dma.done.wait [#allocation3], 256  }
  0x1a   :  { %321 = vsyncadd [#allocation3], 4294967040 }
  0x1b   :  { %322 = dma.done.wait [#allocation6], 512  }
  0x1c   :  { %323 = vsyncadd [#allocation6], 4294966784  ;;  %vm62_vm0 = vcmask 261120   ;;  %v54_v0 = vld [vmem:[#allocation5 + $0x18] sm:$0xff]  ;;  %v53_v1 = vld [vmem:[#allocation5 + $0x10] sm:$0xff]  ;;  %s330_s8 = smov [#allocation7]  }
  0x1d   :  { %236 = vmatprep.subr.mxu0 %v54_v0  ;;  %v49_v2 = vld [vmem:[#allocation2] sm:$0xff]  ;;  %v52_v3 = vld [vmem:[#allocation5 + $0x8] sm:$0xff]  ;;  %v51_v4 = vld [vmem:[#allocation5] sm:$0xff]  ;;  %s212_s9 = sshll.u32 %s330_s8, 4  ;;  %s213_s9 = int_to_ptr.vmem [resolvable:$true] %s212_s9 }
  0x1e   :  { %237 = vmatpush3.msra.mxu0 %v54_v0  ;;  %244 = vmatprep.mubr.msk.f32.mxu0 %vm62_vm0, %v49_v2  ;;  %v50_v5 = vld [vmem:[#allocation2 + $0x8] sm:$0xff]  ;;  %v225_v6 = vld [vmem:[%s398_s2] ss:$0 sm:$0xff]  ;;  %p305_p11 = scmp.lt.s32.totalorder %s213_s9, %s213_s9 }
  0x1f   :  { %238 = vmatprep.subr.mxu0 %v53_v1  ;;  %v228_v45 = vld [vmem:[%s399_s3] ss:$0 sm:$0xff]  ;;  %s300_s3 = scalar_lea.vmem %s213_s9, 256 }
  0x20   :  { %239 = vmatpush3.msra.mxu0 %v53_v1  ;;  %v229_v47 = vld [vmem:[%s400_s4] ss:$0 sm:$0xff]  ;;  %p301_p10 = scmp.ne.s32.totalorder %s213_s9, %s300_s3  ;;  %p306_p12 = scmp.lt.s32.totalorder %s300_s3, %s300_s3 }
  0x21   :  { %240 = vmatprep.subr.mxu0 %v52_v3 }
  0x22   :  { %241 = vmatpush3.msra.mxu0 %v52_v3  ;;  %p307_p13 = por %p306_p12, %p305_p11 }
  0x23   :  { %242 = vmatprep.subr.mxu0 %v51_v4 }
  0x24   :  { %243 = vmatpush3.msra.mxu0 %v51_v4  ;;  %p308_p0 = pnand %p307_p13, %p301_p10 }
  0x25   :  { %245 = vmatmul.mubr.msk.f32.vlgmr.msra.gmra.mxu0 %vm62_vm0, %v50_v5 }
  0xe5   :  { %v246_v7 = vpop.f32.mrf.mxu0 }
  0xe6   :  { %v141_v8 = vadd.f32 %v246_v7, %v225_v6 }
  0xe7   :  { %v135_v9 = vpop.f32.mrf.mxu0 }
  0xe8   :  { %v147_v10 = vmul.f32 0.70710677, %v141_v8  ;;  %v136_v11 = vadd.f32 %v225_v6, %v135_v9  ;;  %v145_v16 = vmul.f32 0.5, %v141_v8 }
  0xea   :  { %252 = verf.f32 %v147_v10  ;;  %v146_v12 = vmul.f32 0.70710677, %v136_v11  ;;  %v144_v17 = vmul.f32 0.5, %v136_v11 }
  0xec   :  { %254 = verf.f32 %v146_v12 }
  0xf7   :  { %v253_v13 = vpop.eup %252 }
  0xf8   :  { %v151_v14 = vadd.f32 1.0, %v253_v13 }
  0xf9   :  { %v255_v15 = vpop.eup %254 }
  0xfa   :  { %v150_v18 = vadd.f32 1.0, %v255_v15  ;;  %v153_v19 = vmul.f32 %v151_v14, %v145_v16 }
  0xfc   :  { %v152_v20 = vmul.f32 %v150_v18, %v144_v17  ;;  %v164_v24 = vmul.f32 %v153_v19, %v153_v19  ;;  %v157_v25 = vsel %vm62_vm0, %v153_v19, 0.0 }
  0xfe   :  { %v154_v21 = vsel %vm62_vm0, %v152_v20, 0.0  ;;  %v163_v22 = vmul.f32 %v152_v20, %v152_v20  ;;  %v168_v26 = vsel %vm62_vm0, %v164_v24, 0.0 }
  0xff   :  { %155 = vadd.xlane.f32.xlu0 %v154_v21 }
 0x100   :  { %v165_v23 = vsel %vm62_vm0, %v163_v22, 0.0 }
 0x101   :  { %166 = vadd.xlane.f32.xlu1 %v165_v23 }
 0x103   :  { %158 = vadd.xlane.f32.xlu0 %v157_v25 }
 0x105   :  { %169 = vadd.xlane.f32.xlu1 %v168_v26 }
 0x188   :  { %v156_v27 = vpop.xlane.xlu0 %155 }
 0x189   :  { %v161_v28 = vmul.f32 0.03125, %v156_v27 }
 0x18a   :  { %v167_v29 = vpop.xlane.xlu1 %166 }
 0x18b   :  { %v173_v30 = vmul.f32 %v161_v28, %v161_v28  ;;  %v171_v31 = vmul.f32 0.03125, %v167_v29  ;;  %v179_v43 = vsub.f32 %v152_v20, %v161_v28 }
 0x18c   :  { %v159_v32 = vpop.xlane.xlu0 %158 }
 0x18d   :  { %v175_v33 = vsub.f32 %v171_v31, %v173_v30  ;;  %v162_v34 = vmul.f32 0.03125, %v159_v32 }
 0x18e   :  { %v170_v35 = vpop.xlane.xlu1 %169 }
 0x18f   :  { %v177_v36 = vmax.f32 %v175_v33, 0.0  ;;  %v174_v37 = vmul.f32 %v162_v34, %v162_v34  ;;  %v172_v38 = vmul.f32 0.03125, %v170_v35  ;;  %v180_v48 = vsub.f32 %v153_v19, %v162_v34 }
 0x191   :  { %v181_v39 = vadd.f32 1e-12, %v177_v36  ;;  %v176_v40 = vsub.f32 %v172_v38, %v174_v37 }
 0x193   :  { %256 = vrsqrt.f32 %v181_v39  ;;  %v178_v41 = vmax.f32 %v176_v40, 0.0 }
 0x195   :  { %v182_v42 = vadd.f32 1e-12, %v178_v41 }
 0x197   :  { %258 = vrsqrt.f32 %v182_v42 }
 0x1a0   :  { %v257_v44 = vpop.eup %256 }
 0x1a1   :  { %v185_v46 = vmul.f32 %v257_v44, %v179_v43 }
 0x1a3   :  { %v194_v49 = vmul.f32 %v228_v45, %v185_v46 }
 0x1a4   :  { %v259_v50 = vpop.eup %258 }
 0x1a5   :  { %v186_v51 = vmul.f32 %v259_v50, %v180_v48  ;;  %v203_v52 = vadd.f32 %v229_v47, %v194_v49 }
 0x1a7   :  { %v195_v53 = vmul.f32 %v228_v45, %v186_v51  ;;  %205 = vst.msk [vmem:[#allocation7] sm:$0xff] %vm62_vm0, %v203_v52 }
 0x1a9   :  { %v204_v54 = vadd.f32 %v229_v47, %v195_v53 }
 0x1ab   :  { %206 = vst.msk [vmem:[#allocation7 + $0x8] sm:$0xff] %vm62_vm0, %v204_v54 }
 0x1ac   :  { %311 = shalt.err (!%p308_p0)
}
 0x1ad   :  { %218 = dma.vmem_to_hbm [thread:$0]  %s213_s9, 256, %s401_s5, [#allocation4], %s327_s21, %s327_s21, %s328_s22  }
 0x1ae   :  { %324 = dma.done.wait [#allocation4], 256  }
 0x1af   :  { %325 = vsyncadd [#allocation4], 4294967040 }
 0x1b0   :  { %222 = vsyncpa [#allocation3], 1 }
 0x1b1   :  { %223 = vsyncpa [#allocation6], 1 }
 0x1b2   :  { %224 = vsyncpa [#allocation4], 1 }

</bundles_post_ra>
